<compile_context>
chip_gen: v7x
topology: tpu7x:2x2x1
jax: 0.10.0
libtpu: 0.0.40
codegen_flags: <defaults>
</compile_context>

<pallas_src>
import math

import jax
import jax.numpy as jnp
from jax.experimental import pallas as pl
from jax.experimental.pallas import tpu as pltpu

SIGMA = 25.0
EMBED_DIM = 10              # GaussianFourierProjection(10) -> 5 frequencies
N_FREQ = EMBED_DIM // 2     # 5
HIDDEN = 50
IN_X = 2
IN_FEAT = IN_X + EMBED_DIM  # 12  (concat order is [x, sin, cos])
OUT = 2

# Merged-first-layer feature scratch: segments at sublane-tile-aligned offsets
# so every row write stays inside a single 8-sublane tile (cheap masked vst).
X_OFF = 0                   # rows 0:2   -> x
SIN_OFF = 8                 # rows 8:13  -> sin features
COS_OFF = 16                # rows 16:21 -> cos features
IN_FEAT_PAD = 24            # K of the merged first matmul (zero padded)

_LOG_SIGMA = math.log(SIGMA)
_TWO_LOG_SIGMA = 2.0 * _LOG_SIGMA
_INV_TWO_LOG_SIGMA = 1.0 / _TWO_LOG_SIGMA


def _score_model_kernel(x_ref, t_ref, wf_ref,
                        w1_ref, b1_ref, w2_ref, b2_ref, w3_ref, b3_ref,
                        out_ref, feat_ref):
    # Batch on the lane axis.
    t = t_ref[...]                                          # (1, Bt)

    # GaussianFourierProjection: 2*pi is already folded into wf at init time.
    t_proj = wf_ref[...] * t                                # (5,1)*(1,Bt) -> (5, Bt)

    # Build concat([x, sin(t_proj), cos(t_proj)]) as sublane rows of a single
    # (24, Bt) scratch so the first Linear is ONE matmul instead of three.
    # Zero every step (not only at program_id==0) so the pad rows are valid on
    # whichever TensorCore owns this grid slice under "parallel" semantics.
    feat_ref[...] = jnp.zeros(feat_ref.shape, jnp.float32)
    feat_ref[X_OFF:X_OFF + IN_X, :] = x_ref[...]            # rows 0:2
    feat_ref[SIN_OFF:SIN_OFF + N_FREQ, :] = jnp.sin(t_proj)  # rows 8:13
    feat_ref[COS_OFF:COS_OFF + N_FREQ, :] = jnp.cos(t_proj)  # rows 16:21

    # net: Linear(12,50) -> Tanh -> Linear(50,50) -> Tanh -> Linear(50,2)
    # TODO(synk): on v6e/v7x only, casting h to bf16 right before tanh would
    # ~2x the EUP-bound transcendental path; kept f32 for cross-chip accuracy.
    h = jnp.tanh(jnp.dot(w1_ref[...], feat_ref[...],
                         preferred_element_type=jnp.float32) + b1_ref[...])   # (50, Bt)
    h = jnp.tanh(jnp.dot(w2_ref[...], h,
                         preferred_element_type=jnp.float32) + b2_ref[...])   # (50, Bt)
    pred = jnp.dot(w3_ref[...], h,
                   preferred_element_type=jnp.float32) + b3_ref[...]          # (2, Bt)

    # 1 / marginal_prob_std(t) = rsqrt((sigma^(2t) - 1) / (2 log sigma))
    # TODO(synk): switch exp(y)-1 to expm1 for small-t accuracy once Mosaic
    # guarantees an expm1 lowering; callers keep t > 0 as in the reference.
    em1 = jnp.exp(_TWO_LOG_SIGMA * t) - 1.0                 # (1, Bt)
    inv_std = jax.lax.rsqrt(em1 * _INV_TWO_LOG_SIGMA)       # (1, Bt)

    out_ref[...] = pred * inv_std                           # (2, Bt), lane-dense


def score_model_time_forward(x, t, params, *, batch_tile=512):
    """x: (B, 2) float32, t: (B,) float32 -> (B, 2) float32."""
    B = x.shape[0]

    # Batch tile: multiple of 128 lanes, capped at `batch_tile`.
    if B >= batch_tile:
        bt = batch_tile
    else:
        bt = ((B + 127) // 128) * 128
    Bp = ((B + bt - 1) // bt) * bt

    # Transposed, zero-padded inputs (pad t with 1.0 so padded lanes stay finite).
    xT = jnp.pad(x.astype(jnp.float32).T, ((0, 0), (0, Bp - B)))            # (2, Bp)
    tT = jnp.pad(t.astype(jnp.float32).reshape(1, B), ((0, 0), (0, Bp - B)),
                 constant_values=1.0)                                        # (1, Bp)

    weights = (params["Wf"], params["W1"], params["b1"],
               params["W2"], params["b2"], params["W3"], params["b3"])
    weight_specs = [pl.BlockSpec(w.shape, lambda i: (0, 0)) for w in weights]

    # EUP is the binding unit: ~112 transcendentals per batch element.
    n_trans_per_row = 2 * N_FREQ + 2 * HIDDEN + 2
    flops = 2 * Bp * (IN_FEAT_PAD * HIDDEN + HIDDEN * HIDDEN + HIDDEN * OUT)
    weight_bytes = sum(int(w.size) * 4 for w in weights)
    cost = pl.CostEstimate(
        flops=flops,
        transcendentals=Bp * n_trans_per_row,
        bytes_accessed=4 * Bp * (IN_X + 1 + OUT) + weight_bytes,
    )

    out_t = pl.pallas_call(
        _score_model_kernel,
        out_shape=jax.ShapeDtypeStruct((OUT, Bp), jnp.float32),
        grid_spec=pltpu.PrefetchScalarGridSpec(
            num_scalar_prefetch=0,
            grid=(Bp // bt,),
            in_specs=[
                pl.BlockSpec((IN_X, bt), lambda i: (0, i)),   # x, lane-dense in B
                pl.BlockSpec((1, bt), lambda i: (0, i)),      # t, lane-dense in B
                *weight_specs,                                # resident across grid
            ],
            out_specs=pl.BlockSpec((OUT, bt), lambda i: (0, i)),
            scratch_shapes=[pltpu.VMEM((IN_FEAT_PAD, bt), jnp.float32)],
        ),
        compiler_params=pltpu.CompilerParams(
            dimension_semantics=("parallel",),   # shards batch tiles over v7x's 2 TCs
        ),
        cost_estimate=cost,
    )(xT, tT, *weights)

    return out_t[:, :B].T                                    # back to (B, 2)


def init_params(key):
    """Deterministic synthetic parameters in the kernel's (out, in) layout."""
    ks = jax.random.split(key, 7)

    # GaussianFourierProjection(10, scale=1): W = randn(5); fold in 2*pi,
    # store as a (5,1) column for lane-broadcast against t:(1,B).
    Wf = jax.random.normal(ks[0], (N_FREQ,), jnp.float32)
    Wf_col = (2.0 * math.pi) * Wf.reshape(N_FREQ, 1)

    def linear_init(kw, kb, fan_in, fan_out):
        bound = 1.0 / math.sqrt(fan_in)
        W = jax.random.uniform(kw, (fan_out, fan_in), jnp.float32, -bound, bound)
        b = jax.random.uniform(kb, (fan_out, 1), jnp.float32, -bound, bound)
        return W, b

    W1, b1 = linear_init(ks[1], ks[2], IN_FEAT, HIDDEN)      # (50,12), (50,1)
    W2, b2 = linear_init(ks[3], ks[4], HIDDEN, HIDDEN)       # (50,50), (50,1)
    W3, b3 = linear_init(ks[5], ks[6], HIDDEN, OUT)          # (2,50),  (2,1)

    # Scatter W1 columns into the padded K=24 layout matching the feature scratch.
    W1p = jnp.zeros((HIDDEN, IN_FEAT_PAD), jnp.float32)
    W1p = W1p.at[:, X_OFF:X_OFF + IN_X].set(W1[:, 0:IN_X])
    W1p = W1p.at[:, SIN_OFF:SIN_OFF + N_FREQ].set(W1[:, IN_X:IN_X + N_FREQ])
    W1p = W1p.at[:, COS_OFF:COS_OFF + N_FREQ].set(W1[:, IN_X + N_FREQ:IN_FEAT])

    return {"Wf": Wf_col, "W1": W1p, "b1": b1,
            "W2": W2, "b2": b2, "W3": W3, "b3": b3}


def _reference_forward(x, t, params):
    """Pure-JAX (batch, feature) reference mirroring the PyTorch module."""
    wf = params["Wf"].reshape(1, N_FREQ)                     # 2*pi already folded in
    t_proj = t.reshape(-1, 1) * wf                           # (B, 5)
    feat = jnp.concatenate([x, jnp.sin(t_proj), jnp.cos(t_proj)], axis=1)   # (B,12)
    W1 = jnp.concatenate([params["W1"][:, X_OFF:X_OFF + IN_X],
                          params["W1"][:, SIN_OFF:SIN_OFF + N_FREQ],
                          params["W1"][:, COS_OFF:COS_OFF + N_FREQ]], axis=1)
    h = jnp.tanh(feat @ W1.T + params["b1"].T)
    h = jnp.tanh(h @ params["W2"].T + params["b2"].T)
    pred = h @ params["W3"].T + params["b3"].T
    std = jnp.sqrt((SIGMA ** (2.0 * t) - 1.0) / (2.0 * math.log(SIGMA)))
    return pred / std.reshape(-1, 1)


if __name__ == "__main__":
    key = jax.random.PRNGKey(0)
    k_param, k_x, k_t = jax.random.split(key, 3)

    params = init_params(k_param)

    B = 8
    x = jax.random.normal(k_x, (B, IN_X), jnp.float32)
    # avoid t == 0 (marginal_prob_std -> 0 there, same caveat as the reference)
    t = jax.random.uniform(k_t, (B,), jnp.float32, minval=0.1, maxval=1.0)

    out = score_model_time_forward(x, t, params)
    out = jax.block_until_ready(out)

    assert out.shape == (B, OUT)
    assert bool(jnp.all(jnp.isfinite(out)))

    ref = _reference_forward(x, t, params)
    max_err = float(jnp.max(jnp.abs(out - ref)))
    assert max_err < 1e-3, f"kernel vs reference mismatch: {max_err}"

    print("KERNEL_OK")
</pallas_src>

<mosaic_0001>
module attributes {stable_mosaic.version = 11 : i64} {
  func.func @_score_model_kernel(%arg0: i32, %arg1: memref<2x128xf32, #tpu.memory_space<vmem>>, %arg2: memref<1x128xf32, #tpu.memory_space<vmem>>, %arg3: memref<5x1xf32, #tpu.memory_space<vmem>>, %arg4: memref<50x24xf32, #tpu.memory_space<vmem>>, %arg5: memref<50x1xf32, #tpu.memory_space<vmem>>, %arg6: memref<50x50xf32, #tpu.memory_space<vmem>>, %arg7: memref<50x1xf32, #tpu.memory_space<vmem>>, %arg8: memref<2x50xf32, #tpu.memory_space<vmem>>, %arg9: memref<2x1xf32, #tpu.memory_space<vmem>>, %arg10: memref<2x128xf32, #tpu.memory_space<vmem>>, %arg11: memref<24x128xf32, #tpu.memory_space<vmem>>) attributes {dimension_semantics = [#tpu.dimension_semantics<parallel>], iteration_bounds = array<i64: 1>, scalar_prefetch = 0 : i64, scratch_operands = 1 : i64, tpu.core_type = #tpu.core_type<tc>, window_params = [{transform_indices = @transform_0, window_bounds = array<i64: 2, 128>}, {transform_indices = @transform_1, window_bounds = array<i64: 1, 128>}, {pipeline_mode = #tpu.pipeline_mode<synchronous>, transform_indices = @transform_2, window_bounds = array<i64: 5, 1>}, {pipeline_mode = #tpu.pipeline_mode<synchronous>, transform_indices = @transform_3, window_bounds = array<i64: 50, 24>}, {pipeline_mode = #tpu.pipeline_mode<synchronous>, transform_indices = @transform_4, window_bounds = array<i64: 50, 1>}, {pipeline_mode = #tpu.pipeline_mode<synchronous>, transform_indices = @transform_5, window_bounds = array<i64: 50, 50>}, {pipeline_mode = #tpu.pipeline_mode<synchronous>, transform_indices = @transform_6, window_bounds = array<i64: 50, 1>}, {pipeline_mode = #tpu.pipeline_mode<synchronous>, transform_indices = @transform_7, window_bounds = array<i64: 2, 50>}, {pipeline_mode = #tpu.pipeline_mode<synchronous>, transform_indices = @transform_8, window_bounds = array<i64: 2, 1>}, {transform_indices = @transform_9, window_bounds = array<i64: 2, 128>}]} {
    %c0 = arith.constant 0 : index
    %c0_0 = arith.constant 0 : index
    %0 = vector.load %arg2[%c0, %c0_0] : memref<1x128xf32, #tpu.memory_space<vmem>>, vector<1x128xf32>
    %c0_1 = arith.constant 0 : index
    %c0_2 = arith.constant 0 : index
    %1 = vector.load %arg3[%c0_1, %c0_2] : memref<5x1xf32, #tpu.memory_space<vmem>>, vector<5x1xf32>
    %2 = vector.broadcast %1 : vector<5x1xf32> to vector<5x128xf32>
    %3 = vector.broadcast %0 : vector<1x128xf32> to vector<5x128xf32>
    %4 = arith.mulf %2, %3 : vector<5x128xf32>
    %cst = arith.constant 0.000000e+00 : f32
    %5 = vector.broadcast %cst : f32 to vector<24x128xf32>
    %c0_3 = arith.constant 0 : index
    %c0_4 = arith.constant 0 : index
    %6 = vector.load %arg11[%c0_3, %c0_4] : memref<24x128xf32, #tpu.memory_space<vmem>>, vector<24x128xf32>
    tpu.vector_store %arg11[%c0_3, %c0_4], %5 {strides = array<i32>} : memref<24x128xf32, #tpu.memory_space<vmem>>, vector<24x128xf32>,
    %c0_5 = arith.constant 0 : index
    %c0_6 = arith.constant 0 : index
    %7 = vector.load %arg1[%c0_5, %c0_6] : memref<2x128xf32, #tpu.memory_space<vmem>>, vector<2x128xf32>
    %c0_7 = arith.constant 0 : index
    %c0_8 = arith.constant 0 : index
    %8 = vector.load %arg11[%c0_7, %c0_8] : memref<24x128xf32, #tpu.memory_space<vmem>>, vector<2x128xf32>
    tpu.vector_store %arg11[%c0_7, %c0_8], %7 {strides = array<i32>} : memref<24x128xf32, #tpu.memory_space<vmem>>, vector<2x128xf32>,
    %9 = math.sin %4 : vector<5x128xf32>
    %c8 = arith.constant 8 : index
    %c0_9 = arith.constant 0 : index
    %10 = vector.load %arg11[%c8, %c0_9] : memref<24x128xf32, #tpu.memory_space<vmem>>, vector<5x128xf32>
    tpu.vector_store %arg11[%c8, %c0_9], %9 {strides = array<i32>} : memref<24x128xf32, #tpu.memory_space<vmem>>, vector<5x128xf32>,
    %11 = math.cos %4 : vector<5x128xf32>
    %c16 = arith.constant 16 : index
    %c0_10 = arith.constant 0 : index
    %12 = vector.load %arg11[%c16, %c0_10] : memref<24x128xf32, #tpu.memory_space<vmem>>, vector<5x128xf32>
    tpu.vector_store %arg11[%c16, %c0_10], %11 {strides = array<i32>} : memref<24x128xf32, #tpu.memory_space<vmem>>, vector<5x128xf32>,
    %c0_11 = arith.constant 0 : index
    %c0_12 = arith.constant 0 : index
    %13 = vector.load %arg4[%c0_11, %c0_12] : memref<50x24xf32, #tpu.memory_space<vmem>>, vector<50x24xf32>
    %c0_13 = arith.constant 0 : index
    %c0_14 = arith.constant 0 : index
    %14 = vector.load %arg11[%c0_13, %c0_14] : memref<24x128xf32, #tpu.memory_space<vmem>>, vector<24x128xf32>
    %cst_15 = arith.constant dense<0.000000e+00> : vector<50x128xf32>
    %15 = tpu.matmul %13, %14, %cst_15 {dimension_numbers = #tpu.dot_dimension_numbers<[1], [0], [0], [1], [0, 0, 1, 1], [], []>} : vector<50x24xf32>, vector<24x128xf32>, vector<50x128xf32> -> vector<50x128xf32>
    %c0_16 = arith.constant 0 : index
    %c0_17 = arith.constant 0 : index
    %16 = vector.load %arg5[%c0_16, %c0_17] : memref<50x1xf32, #tpu.memory_space<vmem>>, vector<50x1xf32>
    %17 = vector.broadcast %16 : vector<50x1xf32> to vector<50x128xf32>
    %18 = arith.addf %15, %17 : vector<50x128xf32>
    %19 = math.tanh %18 : vector<50x128xf32>
    %c0_18 = arith.constant 0 : index
    %c0_19 = arith.constant 0 : index
    %20 = vector.load %arg6[%c0_18, %c0_19] : memref<50x50xf32, #tpu.memory_space<vmem>>, vector<50x50xf32>
    %cst_20 = arith.constant dense<0.000000e+00> : vector<50x128xf32>
    %21 = tpu.matmul %20, %19, %cst_20 {dimension_numbers = #tpu.dot_dimension_numbers<[1], [0], [0], [1], [0, 0, 1, 1], [], []>} : vector<50x50xf32>, vector<50x128xf32>, vector<50x128xf32> -> vector<50x128xf32>
    %c0_21 = arith.constant 0 : index
    %c0_22 = arith.constant 0 : index
    %22 = vector.load %arg7[%c0_21, %c0_22] : memref<50x1xf32, #tpu.memory_space<vmem>>, vector<50x1xf32>
    %23 = vector.broadcast %22 : vector<50x1xf32> to vector<50x128xf32>
    %24 = arith.addf %21, %23 : vector<50x128xf32>
    %25 = math.tanh %24 : vector<50x128xf32>
    %c0_23 = arith.constant 0 : index
    %c0_24 = arith.constant 0 : index
    %26 = vector.load %arg8[%c0_23, %c0_24] : memref<2x50xf32, #tpu.memory_space<vmem>>, vector<2x50xf32>
    %cst_25 = arith.constant dense<0.000000e+00> : vector<2x128xf32>
    %27 = tpu.matmul %26, %25, %cst_25 {dimension_numbers = #tpu.dot_dimension_numbers<[1], [0], [0], [1], [0, 0, 1, 1], [], []>} : vector<2x50xf32>, vector<50x128xf32>, vector<2x128xf32> -> vector<2x128xf32>
    %c0_26 = arith.constant 0 : index
    %c0_27 = arith.constant 0 : index
    %28 = vector.load %arg9[%c0_26, %c0_27] : memref<2x1xf32, #tpu.memory_space<vmem>>, vector<2x1xf32>
    %29 = vector.broadcast %28 : vector<2x1xf32> to vector<2x128xf32>
    %30 = arith.addf %27, %29 : vector<2x128xf32>
    %cst_28 = arith.constant 6.43775177 : f32
    %31 = vector.broadcast %cst_28 : f32 to vector<1x128xf32>
    %32 = arith.mulf %31, %0 : vector<1x128xf32>
    %33 = math.exp %32 : vector<1x128xf32>
    %cst_29 = arith.constant 1.000000e+00 : f32
    %34 = vector.broadcast %cst_29 : f32 to vector<1x128xf32>
    %35 = arith.subf %33, %34 : vector<1x128xf32>
    %cst_30 = arith.constant 0.155333728 : f32
    %36 = vector.broadcast %cst_30 : f32 to vector<1x128xf32>
    %37 = arith.mulf %35, %36 : vector<1x128xf32>
    %38 = math.rsqrt %37 : vector<1x128xf32>
    %39 = vector.broadcast %38 : vector<1x128xf32> to vector<2x128xf32>
    %40 = arith.mulf %30, %39 : vector<2x128xf32>
    %c0_31 = arith.constant 0 : index
    %c0_32 = arith.constant 0 : index
    %41 = vector.load %arg10[%c0_31, %c0_32] : memref<2x128xf32, #tpu.memory_space<vmem>>, vector<2x128xf32>
    tpu.vector_store %arg10[%c0_31, %c0_32], %40 {strides = array<i32>} : memref<2x128xf32, #tpu.memory_space<vmem>>, vector<2x128xf32>,
    return
  }
  func.func @transform_0(%arg0: i32) -> (i32, i32) {
    %c0_i32 = arith.constant 0 : i32
    %c0_i32_0 = arith.constant 0 : i32
    return %c0_i32, %arg0 : i32, i32
  }
  func.func @transform_1(%arg0: i32) -> (i32, i32) {
    %c0_i32 = arith.constant 0 : i32
    %c0_i32_0 = arith.constant 0 : i32
    return %c0_i32, %arg0 : i32, i32
  }
  func.func @transform_2(%arg0: i32) -> (i32, i32) {
    %c0_i32 = arith.constant 0 : i32
    %c0_i32_0 = arith.constant 0 : i32
    %c0_i32_1 = arith.constant 0 : i32
    return %c0_i32, %c0_i32_0 : i32, i32
  }
  func.func @transform_3(%arg0: i32) -> (i32, i32) {
    %c0_i32 = arith.constant 0 : i32
    %c0_i32_0 = arith.constant 0 : i32
    %c0_i32_1 = arith.constant 0 : i32
    return %c0_i32, %c0_i32_0 : i32, i32
  }
  func.func @transform_4(%arg0: i32) -> (i32, i32) {
    %c0_i32 = arith.constant 0 : i32
    %c0_i32_0 = arith.constant 0 : i32
    %c0_i32_1 = arith.constant 0 : i32
    return %c0_i32, %c0_i32_0 : i32, i32
  }
  func.func @transform_5(%arg0: i32) -> (i32, i32) {
    %c0_i32 = arith.constant 0 : i32
    %c0_i32_0 = arith.constant 0 : i32
    %c0_i32_1 = arith.constant 0 : i32
    return %c0_i32, %c0_i32_0 : i32, i32
  }
  func.func @transform_6(%arg0: i32) -> (i32, i32) {
    %c0_i32 = arith.constant 0 : i32
    %c0_i32_0 = arith.constant 0 : i32
    %c0_i32_1 = arith.constant 0 : i32
    return %c0_i32, %c0_i32_0 : i32, i32
  }
  func.func @transform_7(%arg0: i32) -> (i32, i32) {
    %c0_i32 = arith.constant 0 : i32
    %c0_i32_0 = arith.constant 0 : i32
    %c0_i32_1 = arith.constant 0 : i32
    return %c0_i32, %c0_i32_0 : i32, i32
  }
  func.func @transform_8(%arg0: i32) -> (i32, i32) {
    %c0_i32 = arith.constant 0 : i32
    %c0_i32_0 = arith.constant 0 : i32
    %c0_i32_1 = arith.constant 0 : i32
    return %c0_i32, %c0_i32_0 : i32, i32
  }
  func.func @transform_9(%arg0: i32) -> (i32, i32) {
    %c0_i32 = arith.constant 0 : i32
    %c0_i32_0 = arith.constant 0 : i32
    return %c0_i32, %arg0 : i32, i32
  }
}

</mosaic_0001>

<bundles_post_ra>
// kernel: tpu_custom_call.1
= control target key start
LH: loop header
LB: loop body
LE: loop exit
PB: predicated region body
PF: predicated region fallthrough
CT: control target
= control target key end

     0   :  { %v970_v1 = vmov 0   ;;  %v971_v2 = vmov 0.0   ;;  %s1234_s0 = inlined_call_operand.vmem [shape: f32[2,128], index: 0, kind: input, shape index: {}]   ;;  %s1235_s1 = inlined_call_operand.vmem [shape: f32[1,128], index: 1, kind: input, shape index: {}]   ;;  %s1236_s2 = inlined_call_operand.vmem [shape: f32[5,1], index: 2, kind: input, shape index: {}]   ;;  %s1237_s3 = inlined_call_operand.vmem [shape: f32[50,24], index: 3, kind: input, shape index: {}]   ;;  %s1238_s4 = inlined_call_operand.vmem [shape: f32[50,1], index: 4, kind: input, shape index: {}]   ;;  %s1239_s5 = inlined_call_operand.vmem [shape: f32[50,50], index: 5, kind: input, shape index: {}]   ;;  %s1240_s6 = inlined_call_operand.vmem [shape: f32[50,1], index: 6, kind: input, shape index: {}]   ;;  %s1241_s7 = inlined_call_operand.vmem [shape: f32[2,50], index: 7, kind: input, shape index: {}]   ;;  %s1242_s8 = inlined_call_operand.vmem [shape: f32[2,1], index: 8, kind: input, shape index: {}]   ;;  %s1243_s9 = inlined_call_operand.hbm [shape: f32[2,128], index: 9, kind: output, shape index: {}]  }
   0x1   :  { %v34_v0 = vld [vmem:[%s1236_s2] sm:$0x1f]  ;;  %908 = vset.pattern.permute.xlu0 %v970_v1  ;;  %48 = vst [vmem:[#allocation2 + $0x8] sm:$0xff] %v971_v2  ;;  %49 = vst [vmem:[#allocation2 + $0x10] sm:$0xff] %v971_v2  ;;  %909 = vset.pattern.permute.xlu1 %v970_v1 }
   0x2   :  { %47 = vst [vmem:[#allocation2] sm:$0xff] %v971_v2  ;;  %37 = vperm.xlu0 %908, %v34_v0   ;;  %v271_v3 = vld [vmem:[%s1238_s4] sm:$0xff] }
   0x3   :  { %14 = vsyncpa [#allocation4], 0  ;;  %v274_v4 = vld [vmem:[%s1238_s4 + $0x18] sm:$0xff]  ;;  %v276_v5 = vld [vmem:[%s1238_s4 + $0x28] sm:$0xff]  ;;  %v972_v11 = vmov 0.0|0.0   ;;  %vm973_vm0 = vmmov 0   ;;  %v41_v12 = vlaneseq }
   0x4   :  { %v449_v6 = vld [vmem:[%s1240_s6] sm:$0xff]  ;;  %v451_v7 = vld [vmem:[%s1240_s6 + $0x10] sm:$0xff]  ;;  %872 = vmatprep.subr.bf16.mxu0 %v972_v11  ;;  %875 = vmatprep.subr.bf16.mxu1 %v972_v11  ;;  %v272_v16 = vld [vmem:[%s1238_s4 + $0x8] sm:$0xff]  ;;  %v974_v35 = vmov 683565275  }
   0x5   :  { %v453_v8 = vld [vmem:[%s1240_s6 + $0x20] sm:$0xff]  ;;  %v455_v9 = vld [vmem:[%s1240_s6 + $0x30] sm:$0x3]  ;;  %799 = vmatprep.mubr.msk.f32.mxu0 %vm973_vm0, %v971_v2  ;;  %834 = vmatprep.mubr.msk.f32.mxu1 %vm973_vm0, %v971_v2  ;;  %v1067_v13 = vshrl.u32 %v41_v12, 7  ;;  %v450_v27 = vld [vmem:[%s1240_s6 + $0x8] sm:$0xff] }
   0x6   :  { %280 = vperm.xlu0 %908, %v271_v3   ;;  %v50_v10 = vld [vmem:[%s1234_s0] sm:$0x3]  ;;  %285 = vperm.xlu1 %909, %v272_v16   ;;  %v273_v18 = vld [vmem:[%s1238_s4 + $0x10] sm:$0xff]  ;;  %v452_v31 = vld [vmem:[%s1240_s6 + $0x18] sm:$0xff]  ;;  %v975_v37 = vmov 2475754826  }
   0x7   :  { %51 = vst [vmem:[#allocation2] sm:$0x3] %v50_v10  ;;  %v43_v14 = vsub.s32 0, %v1067_v13  ;;  %v1073_v15 = vld [vmem:[%s1235_s1] sm:$0x1]  ;;  %v454_v51 = vld [vmem:[%s1240_s6 + $0x28] sm:$0xff] }
   0x8   :  { %v275_v21 = vld [vmem:[%s1238_s4 + $0x20] sm:$0xff]  ;;  %v277_v24 = vld [vmem:[%s1238_s4 + $0x30] sm:$0x3]  ;;  %v976_v40 = vmov 2131351028  }
   0x9   :  { %v44_v17 = vrot.slane %v1073_v15, %v43_v14  ;;  %v977_v43 = vmov 2102212464   ;;  %v978_v46 = vmov 920167782   ;;  %v979_v49 = vmov 1326507024  }
   0xa   :  { %295 = vperm.xlu0 %908, %v274_v4   ;;  %290 = vperm.xlu1 %909, %v273_v18   ;;  %v625_v61 = vld [vmem:[%s1242_s8] sm:$0x3] }
   0xe   :  { %305 = vperm.xlu0 %908, %v276_v5   ;;  %300 = vperm.xlu1 %909, %v275_v21  }
  0x12   :  { %458 = vperm.xlu0 %908, %v449_v6   ;;  %310 = vperm.xlu1 %909, %v277_v24  }
  0x16   :  { %468 = vperm.xlu0 %908, %v451_v7   ;;  %463 = vperm.xlu1 %909, %v450_v27  }
  0x1a   :  { %478 = vperm.xlu0 %908, %v453_v8   ;;  %473 = vperm.xlu1 %909, %v452_v31  }
  0x1e   :  { %488 = vperm.xlu0 %908, %v455_v9   ;;  %483 = vperm.xlu1 %909, %v454_v51  }
  0x22   :  { %628 = vperm.xlu1 %909, %v625_v61  }
  0x81   :  { %v38_v19 = vpop.permute.xlu0 %37 }
  0x82   :  { %v1084_v20 = vmul.f32 %v44_v17, %v38_v19 }
  0x84   :  { %v55_v22 = vand.u32 2139095040, %v1084_v20  ;;  %v52_v28 = vand.u32 2147483647, %v1084_v20  ;;  %vm54_vm8 = vcmp.lt.s32.totalorder %v1084_v20, 0 }
  0x86   :  { %v56_v23 = vshrl.u32 %v55_v22, 23  ;;  %v59_v32 = vand.u32 8388607, %v52_v28  ;;  %vm53_vm9 = vcmp.le.f32.partialorder %v52_v28, 0.7853982 }
  0x88   :  { %v735_v25 = vadd.s32 4294967169, %v56_v23  ;;  %v60_v52 = vor.u32 8388608, %v59_v32 }
  0x8a   :  { %v62_v26 = vadd.s32 1, %v735_v25  ;;  %v100_v4 = vshll.u32 %v60_v52, 8 }
  0x8c   :  { %vm63_vm1 = vcmp.gt.s32.totalorder %v62_v26, 0 }
  0x8d   :  { %v64_v29 = vsel %vm63_vm1, %v62_v26, 0  ;;  %vm144_vm1 = vweird.f32 %v1084_v20 }
  0x8e   :  { %v66_v30 = vand.u32 31, %v64_v29  ;;  %v65_v34 = vshrl.u32 %v64_v29, 5 }
  0x90   :  { %v67_v33 = vsub.s32 32, %v66_v30  ;;  %v69_v36 = vshll.u32 %v974_v35, %v66_v30  ;;  %v72_v38 = vshll.u32 %v975_v37, %v66_v30  ;;  %v75_v42 = vshll.u32 %v976_v40, %v66_v30 }
  0x91   :  { %v78_v45 = vshll.u32 %v977_v43, %v66_v30  ;;  %v81_v48 = vshll.u32 %v978_v46, %v66_v30  ;;  %vm84_vm2 = vcmp.lt.s32.totalorder %v65_v34, 1  ;;  %vm87_vm3 = vcmp.lt.s32.totalorder %v65_v34, 4 }
  0x92   :  { %v70_v39 = vshrl.u32 %v975_v37, %v67_v33  ;;  %v73_v41 = vshrl.u32 %v976_v40, %v67_v33  ;;  %v76_v44 = vshrl.u32 %v977_v43, %v67_v33  ;;  %v79_v47 = vshrl.u32 %v978_v46, %v67_v33 }
  0x93   :  { %v82_v50 = vshrl.u32 %v979_v49, %v67_v33  ;;  %v68_v62 = vshrl.u32 %v974_v35, %v67_v33  ;;  %vm86_vm4 = vcmp.lt.s32.totalorder %v65_v34, 3  ;;  %vm85_vm5 = vcmp.lt.s32.totalorder %v65_v34, 2 }
  0x94   :  { %v71_v53 = vor.u32 %v70_v39, %v69_v36  ;;  %v74_v54 = vor.u32 %v73_v41, %v72_v38  ;;  %v77_v55 = vor.u32 %v76_v44, %v75_v42  ;;  %v80_v56 = vor.u32 %v79_v47, %v78_v45 }
  0x95   :  { %v83_v57 = vor.u32 %v82_v50, %v81_v48 }
  0x96   :  { %v89_v58 = vsel %vm87_vm3, %v77_v55, 2102212464  ;;  %v92_v59 = vsel %vm84_vm2, %v71_v53, %v74_v54  ;;  %v96_v60 = vsel %vm84_vm2, %v74_v54, %v77_v55  ;;  %v93_v63 = vsel %vm87_vm3, %v80_v56, 920167782 }
  0x97   :  { %v97_v0 = vsel %vm87_vm3, %v83_v57, 1326507024  ;;  %v94_v1 = vsel %vm86_vm4, %v77_v55, %v93_v63  ;;  %v88_v5 = vsel %vm84_vm2, %v68_v62, %v71_v53  ;;  %v90_v6 = vsel %vm86_vm4, %v74_v54, %v89_v58 }
  0x98   :  { %v98_v3 = vsel %vm86_vm4, %v80_v56, %v97_v0  ;;  %v95_v7 = vsel %vm85_vm5, %v92_v59, %v94_v1  ;;  %v91_v17 = vsel %vm85_vm5, %v88_v5, %v90_v6  ;;  %v268_v1 = vld [vmem:[#allocation2] sm:$0xff]  ;;  %vm313_vm2 = vcmask 195584  }
  0x99   :  { %v99_v8 = vsel %vm85_vm5, %v96_v60, %v98_v3  ;;  %v1111_v12 = vmul.u32.u64.low %v100_v4, %v95_v7  ;;  %v1112_v16 = vmul.u32.u64.high %v100_v4, %v95_v7, %v1111_v12  ;;  %v107_v19 = vmul.u32 %v100_v4, %v91_v17  ;;  %v261_v5 = vld [vmem:[%s1237_s3] sm:$0xff]  ;;  %v263_v7 = vld [vmem:[%s1237_s3 + $0x10] sm:$0xff]  ;;  %v281_v17 = vpop.permute.xlu0 %280 }
  0x9a   :  { %v1108_v9 = vmul.u32.u64.low %v100_v4, %v99_v8  ;;  %v1109_v10 = vmul.u32.u64.high %v100_v4, %v99_v8, %v1108_v9  ;;  %v264_v8 = vld [vmem:[%s1237_s3 + $0x18] sm:$0xff]  ;;  %vm513_vm3 = vcmask 1041408   ;;  %vm491_vm4 = vcmask 408576  }
  0x9b   :  { %v110_v18 = vadd.s32 1, %v1112_v16  ;;  %v265_v9 = vld [vmem:[%s1237_s3 + $0x20] sm:$0xff] }
  0x9c   :  { %vm109_vm6 = vc.u32 %v1109_v10, %v1111_v12  ;;  %v108_v33 = vadd.s32 %v1111_v12, %v1109_v10  ;;  %v266_v10 = vld [vmem:[%s1237_s3 + $0x28] sm:$0xff]  ;;  %v267_v12 = vld [vmem:[%s1237_s3 + $0x30] sm:$0x3] }
  0x9d   :  { %v111_v21 = vsel %vm109_vm6, %v110_v18, %v1112_v16 }
  0x9e   :  { %v112_v22 = vadd.s32 %v111_v21, %v107_v19  ;;  %v286_v21 = vpop.permute.xlu1 %285 }
  0xa0   :  { %v113_v23 = vadd.s32 536870912, %v112_v22 }
  0xa2   :  { %v114_v24 = vshrl.u32 %v113_v23, 30 }
  0xa4   :  { %v115_v25 = vshll.u32 %v114_v24, 30  ;;  %v138_v45 = vsub.s32 4, %v114_v24 }
  0xa6   :  { %v116_v26 = vsub.s32 %v112_v22, %v115_v25  ;;  %v139_v48 = vsel %vm54_vm8, %v138_v45, %v114_v24 }
  0xa7   :  { %v141_v50 = vsel %vm53_vm9, 0, %v139_v48 }
  0xa8   :  { %v118_v27 = vsub.s32 0, %v116_v26  ;;  %v145_v51 = vadd.s32 3, %v141_v50  ;;  %v250_v53 = vand.u32 3, %v141_v50 }
  0xaa   :  { %v736_v29 = vmin.u32 %v118_v27, %v116_v26  ;;  %v146_v52 = vand.u32 3, %v145_v51  ;;  %vm255_vm11 = vcmp.eq.s32.totalorder %v250_v53, 2  ;;  %vm252_vm13 = vcmp.eq.s32.totalorder %v250_v53, 0 }
  0xab   :  { %vm251_vm15 = vcmp.lt.s32.totalorder %v250_v53, 2 }
  0xac   :  { %v120_v30 = vclz %v736_v29  ;;  %vm151_vm10 = vcmp.eq.s32.totalorder %v146_v52, 2  ;;  %vm148_vm12 = vcmp.eq.s32.totalorder %v146_v52, 0  ;;  %vm147_vm14 = vcmp.lt.s32.totalorder %v146_v52, 2 }
  0xae   :  { %v737_v31 = vadd.s32 4294967294, %v120_v30  ;;  %v296_v30 = vpop.permute.xlu0 %295 }
  0xb0   :  { %vm738_vm7 = vcmp.lt.s32.totalorder %v737_v31, 0 }
  0xb1   :  { %v123_v32 = vsel %vm738_vm7, 0, %v737_v31 }
  0xb2   :  { %v124_v34 = vsub.s32 32, %v123_v32  ;;  %v128_v35 = vsub.s32 4294967266, %v123_v32  ;;  %v125_v36 = vshll.u32 %v116_v26, %v123_v32  ;;  %v291_v26 = vpop.permute.xlu1 %290 }
  0xb4   :  { %v126_v37 = vshrl.u32 %v108_v33, %v124_v34  ;;  %v129_v38 = vadd.s32 127, %v128_v35 }
  0xb6   :  { %v127_v39 = vor.u32 %v126_v37, %v125_v36  ;;  %v130_v40 = vshll.u32 %v129_v38, 23  ;;  %v301_v37 = vpop.permute.xlu1 %300 }
  0xb8   :  { %v131_v41 = vor.u32 4788187, %v130_v40  ;;  %v134_v43 = vcvt.s32.f32 %v127_v39 }
  0xba   :  { %v132_v42 = vand.u32 2147483647, %v131_v41  ;;  %v306_v41 = vpop.permute.xlu0 %305 }
  0xbc   :  { %v135_v44 = vmul.f32 %v134_v43, %v132_v42 }
  0xbe   :  { %v136_v46 = vxor.u32 2147483648, %v135_v44 }
  0xc0   :  { %v137_v47 = vsel %vm54_vm8, %v136_v46, %v135_v44  ;;  %v311_v46 = vpop.permute.xlu1 %310 }
  0xc1   :  { %v140_v49 = vsel %vm53_vm9, %v1084_v20, %v137_v47  ;;  %v262_v20 = vld [vmem:[%s1237_s3 + $0x8] sm:$0xff] }
  0xc2   :  { %910 = vcosq.f32 %v140_v49 }
  0xc3   :  { %912 = vsinq.f32 %v140_v49 }
  0xcc   :  { %v911_v54 = vpop.eup %910 }
  0xcd   :  { %v913_v55 = vpop.eup %912  ;;  %v152_v56 = vxor.u32 2147483648, %v911_v54 }
  0xce   :  { %v149_v57 = vxor.u32 2147483648, %v913_v55 }
  0xcf   :  { %v153_v58 = vsel %vm151_vm10, %v152_v56, %v913_v55  ;;  %v257_v28 = vsel %vm255_vm11, %v152_v56, %v913_v55  ;;  %v442_v55 = vld [vmem:[%s1239_s5] sm:$0xff] }
  0xd0   :  { %v150_v59 = vsel %vm148_vm12, %v911_v54, %v149_v57  ;;  %v254_v60 = vsel %vm252_vm13, %v911_v54, %v149_v57  ;;  %v443_v57 = vld [vmem:[%s1239_s5 + $0x8] sm:$0xff] }
  0xd1   :  { %v154_v61 = vsel %vm147_vm14, %v150_v59, %v153_v58  ;;  %v258_v62 = vsel %vm251_vm15, %v254_v60, %v257_v28  ;;  %v444_v58 = vld [vmem:[%s1239_s5 + $0x10] sm:$0xff]  ;;  %v445_v28 = vld [vmem:[%s1239_s5 + $0x18] sm:$0xff]  ;;  %v446_v59 = vld [vmem:[%s1239_s5 + $0x20] sm:$0xff] }
  0xd2   :  { %v155_v63 = vsel %vm144_vm1, nan, %v154_v61  ;;  %v259_v0 = vsel %vm144_vm1, nan, %v258_v62  ;;  %v447_v60 = vld [vmem:[%s1239_s5 + $0x28] sm:$0xff]  ;;  %v448_v61 = vld [vmem:[%s1239_s5 + $0x30] sm:$0x3] }
  0xd3   :  { %156 = vst [vmem:[#allocation2 + $0x8] sm:$0x1f] %v155_v63  ;;  %260 = vst [vmem:[#allocation2 + $0x10] sm:$0x1f] %v259_v0  ;;  %v459_v63 = vpop.permute.xlu0 %458 }
  0xda   :  { %v269_v3 = vld [vmem:[#allocation2 + $0x8] sm:$0xff]  ;;  %v270_v6 = vld [vmem:[#allocation2 + $0x10] sm:$0xff] }
  0xdb   :  { %v873_v4 = vpack.c.bf16 %v269_v3, %v268_v1  ;;  %v464_v3 = vpop.permute.xlu1 %463 }
  0xdd   :  { %874 = vmatpush3.bf16.msra.mxu0 %v873_v4 }
  0xde   :  { %797 = vmatprep.subr.mxu0 %v971_v2 }
  0xe1   :  { %798 = vmatpush3.msra.mxu0 %v270_v6 }
  0xe2   :  { %800 = vmatmul.mubr.msk.f32.vlgmr.msra.gmra.mrb[0].mxu0 %vm313_vm2, %v261_v5  ;;  %884 = vmatprep.subr.bf16.mxu0 %v972_v11 }
  0xe3   :  { %802 = vmatprep.mubr.msk.f32.mxu0 %vm973_vm0, %v971_v2 }
  0xe6   :  { %803 = vmatmul.mubr.msk.f32.gmra.mrb[2].mxu0 %vm313_vm2, %v262_v20 }
  0xe7   :  { %805 = vmatprep.mubr.msk.f32.mxu0 %vm973_vm0, %v971_v2 }
  0xea   :  { %806 = vmatmul.mubr.msk.f32.gmra.mrb[4].mxu0 %vm313_vm2, %v263_v7  ;;  %v469_v7 = vpop.permute.xlu0 %468 }
  0xeb   :  { %808 = vmatprep.mubr.msk.f32.mxu0 %vm973_vm0, %v971_v2 }
  0xee   :  { %809 = vmatmul.mubr.msk.f32.gmra.mrb[6].mxu0 %vm313_vm2, %v264_v8 }
  0xef   :  { %811 = vmatprep.mubr.msk.f32.mxu0 %vm973_vm0, %v971_v2 }
  0xf2   :  { %812 = vmatmul.mubr.msk.f32.gmra.mrb[8].mxu0 %vm313_vm2, %v265_v9 }
  0xf3   :  { %814 = vmatprep.mubr.msk.f32.mxu0 %vm973_vm0, %v971_v2 }
  0xf6   :  { %815 = vmatmul.mubr.msk.f32.gmra.mrb[10].mxu0 %vm313_vm2, %v266_v10  ;;  %v474_v10 = vpop.permute.xlu1 %473 }
  0xf7   :  { %817 = vmatprep.mubr.msk.f32.mxu0 %vm973_vm0, %v971_v2 }
  0xfa   :  { %818 = vmatmul.mubr.msk.f32.gmra.mrb[12].mxu0 %vm313_vm2, %v267_v12 }
  0xfb   :  { %869 = vmatprep.mubr.msk.f32.mxu0 %vm973_vm0, %v971_v2 }
 0x1b5   :  { %v401_v16 = vpop.f32.mrb[0].mxu0 }
 0x1b6   :  { %v801_v18 = vpop.f32.mrb[1].mxu0  ;;  %v402_v19 = vadd.f32 %v401_v16, %v281_v17 }
 0x1b8   :  { %914 = vtanh.f32 %v402_v19 }
 0x1b9   :  { %v406_v22 = vpop.f32.mrb[2].mxu0 }
 0x1ba   :  { %v407_v23 = vadd.f32 %v406_v22, %v286_v21  ;;  %v804_v24 = vpop.f32.mrb[3].mxu0  ;;  %v479_v22 = vpop.permute.xlu0 %478 }
 0x1bc   :  { %916 = vtanh.f32 %v407_v23 }
 0x1bd   :  { %v411_v25 = vpop.f32.mrb[4].mxu0 }
 0x1be   :  { %v807_v27 = vpop.f32.mrb[5].mxu0  ;;  %v412_v29 = vadd.f32 %v411_v25, %v291_v26  ;;  %v484_v26 = vpop.permute.xlu1 %483 }
 0x1c0   :  { %918 = vtanh.f32 %v412_v29 }
 0x1c1   :  { %v416_v31 = vpop.f32.mrb[6].mxu0 }
 0x1c2   :  { %v417_v32 = vadd.f32 %v416_v31, %v296_v30  ;;  %v810_v33 = vpop.f32.mrb[7].mxu0  ;;  %v915_v34 = vpop.eup %914 }
 0x1c4   :  { %920 = vtanh.f32 %v417_v32  ;;  %v489_v32 = vpop.permute.xlu0 %488 }
 0x1c5   :  { %v421_v35 = vpop.f32.mrb[8].mxu0 }
 0x1c6   :  { %v917_v36 = vpop.eup %916  ;;  %v813_v38 = vpop.f32.mrb[9].mxu0  ;;  %v422_v39 = vadd.f32 %v421_v35, %v301_v37 }
 0x1c7   :  { %v876_v40 = vpack.c.bf16 %v917_v36, %v915_v34 }
 0x1c8   :  { %922 = vtanh.f32 %v422_v39 }
 0x1c9   :  { %v426_v42 = vpop.f32.mrb[10].mxu0  ;;  %877 = vmatpush3.bf16.msra.mxu1 %v876_v40 }
 0x1ca   :  { %v427_v43 = vadd.f32 %v426_v42, %v306_v41  ;;  %v816_v44 = vpop.f32.mrb[11].mxu0  ;;  %878 = vmatprep.subr.bf16.mxu1 %v972_v11  ;;  %v919_v45 = vpop.eup %918  ;;  %v624_v41 = vld [vmem:[%s1241_s7] sm:$0x3]  ;;  %s980_s7 = smov [#allocation3]  }
 0x1cb   :  { %s727_s8 = sshll.u32 %s980_s7, 4  ;;  %s728_s8 = int_to_ptr.vmem [resolvable:$true] %s727_s8 }
 0x1cc   :  { %924 = vtanh.f32 %v427_v43  ;;  %v707_v43 = vmul.f32 6.437752, %v1073_v15  ;;  %s946_s19 = scalar_lea.vmem %s728_s8, 32  ;;  %p951_p1 = scmp.lt.s32.totalorder %s728_s8, %s728_s8 }
 0x1cd   :  { %v431_v47 = vpop.f32.mrb[12].mxu0  ;;  %p947_p0 = scmp.ne.s32.totalorder %s728_s8, %s946_s19  ;;  %p952_p2 = scmp.lt.s32.totalorder %s946_s19, %s946_s19 }
 0x1ce   :  { %v921_v48 = vpop.eup %920  ;;  %v432_v49 = vadd.f32 %v431_v47, %v311_v46  ;;  %v819_v50 = vpop.f32.mrb[13].mxu0  ;;  %v708_v44 = vmul.f32 1.442695, %v707_v43 }
 0x1cf   :  { %v879_v51 = vpack.c.bf16 %v921_v48, %v919_v45  ;;  %v629_v48 = vpop.permute.xlu1 %628  ;;  %p953_p3 = por %p952_p2, %p951_p1 }
 0x1d0   :  { %926 = vtanh.f32 %v432_v49 }
 0x1d1   :  { %880 = vmatpush3.bf16.msra.mxu1 %v879_v51  ;;  %p954_p4 = pnand %p953_p3, %p947_p0 }
 0x1d2   :  { %881 = vmatprep.subr.bf16.mxu1 %v972_v11  ;;  %v923_v52 = vpop.eup %922 }
 0x1d6   :  { %v925_v53 = vpop.eup %924 }
 0x1d7   :  { %v882_v54 = vpack.c.bf16 %v925_v53, %v923_v52 }
 0x1d9   :  { %883 = vmatpush3.bf16.msra.mxu1 %v882_v54 }
 0x1da   :  { %832 = vmatprep.subr.mxu1 %v971_v2  ;;  %v927_v56 = vpop.eup %926 }
 0x1dd   :  { %833 = vmatpush3.msk.msra.mxu1 %vm513_vm3, %v927_v56 }
 0x1de   :  { %835 = vmatmul.mubr.msk.f32.vlgmr.msra.gmra.mrb[0].mxu1 %vm491_vm4, %v442_v55 }
 0x1df   :  { %837 = vmatprep.mubr.msk.f32.mxu1 %vm973_vm0, %v971_v2 }
 0x1e2   :  { %838 = vmatmul.mubr.msk.f32.gmra.mrb[2].mxu1 %vm491_vm4, %v443_v57 }
 0x1e3   :  { %840 = vmatprep.mubr.msk.f32.mxu1 %vm973_vm0, %v971_v2 }
 0x1e6   :  { %841 = vmatmul.mubr.msk.f32.gmra.mrb[4].mxu1 %vm491_vm4, %v444_v58 }
 0x1e7   :  { %843 = vmatprep.mubr.msk.f32.mxu1 %vm973_vm0, %v971_v2 }
 0x1ea   :  { %844 = vmatmul.mubr.msk.f32.gmra.mrb[6].mxu1 %vm491_vm4, %v445_v28 }
 0x1eb   :  { %846 = vmatprep.mubr.msk.f32.mxu1 %vm973_vm0, %v971_v2 }
 0x1ee   :  { %847 = vmatmul.mubr.msk.f32.gmra.mrb[8].mxu1 %vm491_vm4, %v446_v59 }
 0x1ef   :  { %849 = vmatprep.mubr.msk.f32.mxu1 %vm973_vm0, %v971_v2 }
 0x1f2   :  { %850 = vmatmul.mubr.msk.f32.gmra.mrb[10].mxu1 %vm491_vm4, %v447_v60 }
 0x1f3   :  { %852 = vmatprep.mubr.msk.f32.mxu1 %vm973_vm0, %v971_v2 }
 0x1f6   :  { %853 = vmatmul.mubr.msk.f32.gmra.mrb[12].mxu1 %vm491_vm4, %v448_v61 }
 0x2b1   :  { %v583_v62 = vpop.f32.mrb[0].mxu1 }
 0x2b2   :  { %v836_v0 = vpop.f32.mrb[1].mxu1  ;;  %v584_v1 = vadd.f32 %v583_v62, %v459_v63 }
 0x2b4   :  { %928 = vtanh.f32 %v584_v1 }
 0x2b5   :  { %v588_v4 = vpop.f32.mrb[2].mxu1 }
 0x2b6   :  { %v589_v5 = vadd.f32 %v588_v4, %v464_v3  ;;  %v839_v6 = vpop.f32.mrb[3].mxu1 }
 0x2b8   :  { %930 = vtanh.f32 %v589_v5 }
 0x2b9   :  { %v593_v20 = vpop.f32.mrb[4].mxu1 }
 0x2ba   :  { %v842_v8 = vpop.f32.mrb[5].mxu1  ;;  %v594_v9 = vadd.f32 %v593_v20, %v469_v7 }
 0x2bc   :  { %932 = vtanh.f32 %v594_v9 }
 0x2bd   :  { %v598_v12 = vpop.f32.mrb[6].mxu1 }
 0x2be   :  { %v599_v16 = vadd.f32 %v598_v12, %v474_v10  ;;  %v845_v17 = vpop.f32.mrb[7].mxu1  ;;  %v929_v18 = vpop.eup %928 }
 0x2c0   :  { %934 = vtanh.f32 %v599_v16 }
 0x2c1   :  { %v603_v19 = vpop.f32.mrb[8].mxu1 }
 0x2c2   :  { %v931_v21 = vpop.eup %930  ;;  %v848_v23 = vpop.f32.mrb[9].mxu1  ;;  %v604_v24 = vadd.f32 %v603_v19, %v479_v22 }
 0x2c3   :  { %v885_v25 = vpack.c.bf16 %v931_v21, %v929_v18 }
 0x2c4   :  { %936 = vtanh.f32 %v604_v24 }
 0x2c5   :  { %v608_v27 = vpop.f32.mrb[10].mxu1  ;;  %886 = vmatpush3.bf16.msra.mxu0 %v885_v25 }
 0x2c6   :  { %v609_v29 = vadd.f32 %v608_v27, %v484_v26  ;;  %v851_v30 = vpop.f32.mrb[11].mxu1  ;;  %887 = vmatprep.subr.bf16.mxu0 %v972_v11  ;;  %v933_v31 = vpop.eup %932 }
 0x2c8   :  { %938 = vtanh.f32 %v609_v29 }
 0x2c9   :  { %v613_v33 = vpop.f32.mrb[12].mxu1 }
 0x2ca   :  { %v935_v34 = vpop.eup %934  ;;  %v614_v35 = vadd.f32 %v613_v33, %v489_v32  ;;  %v854_v36 = vpop.f32.mrb[13].mxu1 }
 0x2cb   :  { %v888_v37 = vpack.c.bf16 %v935_v34, %v933_v31 }
 0x2cc   :  { %940 = vtanh.f32 %v614_v35 }
 0x2cd   :  { %889 = vmatpush3.bf16.msra.mxu0 %v888_v37  ;;  %942 = vpow2.f32 %v708_v44 }
 0x2ce   :  { %890 = vmatprep.subr.bf16.mxu0 %v972_v11  ;;  %v937_v38 = vpop.eup %936 }
 0x2d2   :  { %v939_v39 = vpop.eup %938 }
 0x2d3   :  { %v891_v40 = vpack.c.bf16 %v939_v39, %v937_v38 }
 0x2d5   :  { %892 = vmatpush3.bf16.msra.mxu0 %v891_v40 }
 0x2d6   :  { %867 = vmatprep.subr.mxu0 %v971_v2  ;;  %v941_v42 = vpop.eup %940 }
 0x2d7   :  { %v943_v11 = vpop.eup %942 }
 0x2d8   :  { %v760_v45 = vadd.f32 -1.0, %v943_v11 }
 0x2d9   :  { %868 = vmatpush3.msk.msra.mxu0 %vm513_vm3, %v941_v42 }
 0x2da   :  { %870 = vmatmul.mubr.msk.f32.vlgmr.msra.gmra.mrb[14].mxu0 %vm491_vm4, %v624_v41  ;;  %v711_v46 = vmul.f32 0.15533373, %v760_v45 }
 0x2dc   :  { %944 = vrsqrt.f32 %v711_v46 }
 0x2e6   :  { %v945_v47 = vpop.eup %944 }
 0x2e7   :  { %v717_v2 = vrot.slane %v945_v47, %v43_v14 }
 0x3ad   :  { %v703_v49 = vpop.f32.mrb[14].mxu0 }
 0x3ae   :  { %v704_v50 = vadd.f32 %v703_v49, %v629_v48  ;;  %v871_v51 = vpop.f32.mrb[15].mxu0 }
 0x3b0   :  { %v719_v52 = vmul.f32 %v717_v2, %v704_v50 }
 0x3b2   :  { %720 = vst [vmem:[#allocation3] sm:$0x3] %v719_v52 }
 0x3b3   :  { %957 = shalt.err (!%p954_p4)
}
 0x3b4   :  { %s958_s22 = scalar_lea.hbm %s1243_s9, 32 }
 0x3b5   :  { %p959_p5 = scmp.ne.s32.totalorder %s1243_s9, %s958_s22  ;;  %p962_p6 = scmp.lt.u32.totalorder %s958_s22, %s1243_s9 }
 0x3b7   :  { %p964_p7 = pnand %p962_p6, %p959_p5 }
 0x3b9   :  { %967 = shalt.err (!%p964_p7)
}
 0x3ba   :  { %730 = dma.vmem_to_hbm [thread:$0]  %s728_s8, 32, %s1243_s9, [#allocation4]  }
 0x3bb   :  { %968 = dma.done.wait [#allocation4], 32  }
 0x3bc   :  { %969 = vsyncadd [#allocation4], 4294967264 }
 0x3bd   :  { %734 = vsyncpa [#allocation4], 1 }

</bundles_post_ra>
